<compile_context>
chip_gen: v5e
topology: v5e:2x2
jax: 0.10.0
libtpu: 0.0.40
codegen_flags: <defaults>
</compile_context>

<pallas_src>
import functools

import jax
import jax.numpy as jnp
from jax.experimental import pallas as pl
from jax.experimental.pallas import tpu as pltpu


def _round_up(x, m):
    return (x + m - 1) // m * m


# Scoped VMEM budget: leaves headroom under v7x's 64 MiB per TensorCore and is
# far below v5e/v6e's 128 MiB.
_VMEM_BUDGET = 48 * 1024 * 1024


def _matmul_bias_kernel(x_ref, w_ref, b_ref, o_ref):
    """o = x @ w + b in one shot (no K reduction axis in the grid)."""
    o_ref[...] = (
        jnp.dot(x_ref[...], w_ref[...], preferred_element_type=jnp.float32)
        + b_ref[...]
    ).astype(o_ref.dtype)


def _matmul_bias_acc_kernel(x_ref, w_ref, b_ref, o_ref, acc_ref):
    """o = x @ w + b with K as the last ('arbitrary') grid axis."""

    @pl.when(pl.program_id(2) == 0)
    def _init():
        acc_ref[...] = jnp.zeros_like(acc_ref)

    acc_ref[...] += jnp.dot(
        x_ref[...], w_ref[...], preferred_element_type=jnp.float32
    )

    @pl.when(pl.program_id(2) == pl.num_programs(2) - 1)
    def _finalize():
        o_ref[...] = (acc_ref[...] + b_ref[...]).astype(o_ref.dtype)


def _resident_bytes(K, N, tm):
    """Rough VMEM need for the resident-W path (double-buffered allocations)."""
    return 4 * (
        2 * K * N            # resident weight (allocation is double-buffered)
        + 2 * tm * K         # x tile double buffer
        + 2 * tm * N         # output tile double buffer
        + 2 * 8 * _round_up(N, 128)  # bias (padded layout)
    )


@functools.partial(jax.jit, static_argnames=("tm", "tn", "tk"))
def adapter_forward(x, w, b, *, tm=512, tn=512, tk=2048):
    """Adapter.forward: y = x @ w + b  (== nn.Linear(d_src, d_tgt)).

    x: (..., d_src) f32
    w: (d_src, d_tgt) f32  (pre-transposed vs torch's (d_tgt, d_src))
    b: (d_tgt,)     f32
    """
    orig_shape = x.shape
    K = orig_shape[-1]
    N = w.shape[1]
    M = 1
    for s in orig_shape[:-1]:
        M *= s
    x2 = x.reshape(M, K)          # collapse of leading dims: no copy
    b2 = b.reshape(1, N)          # free; params are static per adapter

    # Prefer >= 2 M tiles (v7x has 2 TensorCores) when the halved tile is
    # still large enough to amortize per-grid-step overhead.
    if M >= 512:
        tm = min(tm, max(256, _round_up((M + 1) // 2, 8)))
    tm = min(tm, _round_up(M, 8))

    compiler_params = lambda sem: pltpu.CompilerParams(  # noqa: E731
        dimension_semantics=sem, vmem_limit_bytes=_VMEM_BUDGET
    )

    # ---------------------------------------------------------------- Path A
    # Resident-W: weight + bias fetched once and kept in VMEM; only M tiled.
    tm_res = tm
    while tm_res > 8 and _resident_bytes(K, N, tm_res) > _VMEM_BUDGET:
        tm_res = _round_up(tm_res // 2, 8)

    if _resident_bytes(K, N, tm_res) <= _VMEM_BUDGET:
        tm = tm_res
        out = pl.pallas_call(
            _matmul_bias_kernel,
            out_shape=jax.ShapeDtypeStruct((M, N), x.dtype),
            grid_spec=pltpu.PrefetchScalarGridSpec(
                num_scalar_prefetch=0,
                grid=(pl.cdiv(M, tm),),
                in_specs=[
                    pl.BlockSpec((tm, K), lambda i: (i, 0)),
                    pl.BlockSpec((K, N), lambda i: (0, 0)),   # resident weight
                    pl.BlockSpec((1, N), lambda i: (0, 0)),   # resident bias
                ],
                out_specs=pl.BlockSpec((tm, N), lambda i: (i, 0)),
            ),
            compiler_params=compiler_params(("parallel",)),
        )(x2, w, b2)
        return out.reshape(orig_shape[:-1] + (N,))

    # ---------------------------------------------------------------- Path B
    # Weight too large to keep fully resident, but K fits a single tile:
    # 2-D grid over (M, N); still no accumulator and no host padding.
    tn = min(tn, _round_up(N, 128))
    tk = min(tk, _round_up(K, 128))

    if _round_up(K, 128) <= tk:
        out = pl.pallas_call(
            _matmul_bias_kernel,
            out_shape=jax.ShapeDtypeStruct((M, N), x.dtype),
            grid_spec=pltpu.PrefetchScalarGridSpec(
                num_scalar_prefetch=0,
                grid=(pl.cdiv(M, tm), pl.cdiv(N, tn)),
                in_specs=[
                    pl.BlockSpec((tm, K), lambda i, j: (i, 0)),
                    pl.BlockSpec((K, tn), lambda i, j: (0, j)),
                    pl.BlockSpec((1, tn), lambda i, j: (0, j)),
                ],
                out_specs=pl.BlockSpec((tm, tn), lambda i, j: (i, j)),
            ),
            compiler_params=compiler_params(("parallel", "parallel")),
        )(x2, w, b2)
        return out.reshape(orig_shape[:-1] + (N,))

    # ---------------------------------------------------------------- Path C
    # Very large K: tile K as the last ('arbitrary') grid axis with a VMEM
    # f32 accumulator.  Only K needs zero padding (a garbage K tail would
    # corrupt valid outputs); partial M/N edge blocks are handled by Pallas.
    Kp = _round_up(K, tk)
    x2p = jnp.pad(x2, ((0, 0), (0, Kp - K))) if Kp != K else x2
    wp = jnp.pad(w, ((0, Kp - K), (0, 0))) if Kp != K else w

    out = pl.pallas_call(
        _matmul_bias_acc_kernel,
        out_shape=jax.ShapeDtypeStruct((M, N), x.dtype),
        grid_spec=pltpu.PrefetchScalarGridSpec(
            num_scalar_prefetch=0,
            grid=(pl.cdiv(M, tm), pl.cdiv(N, tn), Kp // tk),
            in_specs=[
                pl.BlockSpec((tm, tk), lambda i, j, k: (i, k)),
                pl.BlockSpec((tk, tn), lambda i, j, k: (k, j)),
                pl.BlockSpec((1, tn), lambda i, j, k: (0, j)),
            ],
            out_specs=pl.BlockSpec((tm, tn), lambda i, j, k: (i, j)),
            scratch_shapes=[pltpu.VMEM((tm, tn), jnp.float32)],
        ),
        compiler_params=compiler_params(("parallel", "parallel", "arbitrary")),
    )(x2p, wp, b2)
    return out.reshape(orig_shape[:-1] + (N,))


# ----------------------------------------------------------------------------
if __name__ == "__main__":
    B, S, d_src, d_tgt = 2, 8, 32, 64

    key0 = jax.random.PRNGKey(0)
    kx, kw, kb = jax.random.split(key0, 3)

    # Weight stored as (in_features, out_features) == torch_weight.T.
    w = 0.02 * jax.random.normal(kw, (d_src, d_tgt), dtype=jnp.float32)
    b = 0.01 * jax.random.normal(kb, (d_tgt,), dtype=jnp.float32)
    x = jax.random.normal(kx, (B, S, d_src), dtype=jnp.float32)

    y = adapter_forward(x, w, b)
    y = jax.block_until_ready(y)

    # Pure-JAX reference (silent correctness check).
    ref = (x.reshape(B * S, d_src) @ w + b).reshape(B, S, d_tgt)

    assert y.shape == (B, S, d_tgt)
    assert jnp.allclose(y, ref, atol=1e-4, rtol=1e-4), "mismatch vs reference"

    print("KERNEL_OK")
</pallas_src>

<mosaic_0001>
module attributes {stable_mosaic.version = 11 : i64} {
  func.func @_matmul_bias_kernel(%arg0: i32, %arg1: memref<16x32xf32, #tpu.memory_space<vmem>>, %arg2: memref<32x64xf32, #tpu.memory_space<vmem>>, %arg3: memref<1x64xf32, #tpu.memory_space<vmem>>, %arg4: memref<16x64xf32, #tpu.memory_space<vmem>>) attributes {dimension_semantics = [#tpu.dimension_semantics<parallel>], iteration_bounds = array<i64: 1>, scalar_prefetch = 0 : i64, scratch_operands = 0 : i64, tpu.core_type = #tpu.core_type<tc>, window_params = [{transform_indices = @transform_0, window_bounds = array<i64: 16, 32>}, {pipeline_mode = #tpu.pipeline_mode<synchronous>, transform_indices = @transform_1, window_bounds = array<i64: 32, 64>}, {pipeline_mode = #tpu.pipeline_mode<synchronous>, transform_indices = @transform_2, window_bounds = array<i64: 1, 64>}, {transform_indices = @transform_3, window_bounds = array<i64: 16, 64>}]} {
    %c0 = arith.constant 0 : index
    %c0_0 = arith.constant 0 : index
    %0 = vector.load %arg1[%c0, %c0_0] : memref<16x32xf32, #tpu.memory_space<vmem>>, vector<16x32xf32>
    %c0_1 = arith.constant 0 : index
    %c0_2 = arith.constant 0 : index
    %1 = vector.load %arg2[%c0_1, %c0_2] : memref<32x64xf32, #tpu.memory_space<vmem>>, vector<32x64xf32>
    %cst = arith.constant dense<0.000000e+00> : vector<16x64xf32>
    %2 = tpu.matmul %0, %1, %cst {dimension_numbers = #tpu.dot_dimension_numbers<[1], [0], [0], [1], [0, 0, 1, 1], [], []>} : vector<16x32xf32>, vector<32x64xf32>, vector<16x64xf32> -> vector<16x64xf32>
    %c0_3 = arith.constant 0 : index
    %c0_4 = arith.constant 0 : index
    %3 = vector.load %arg3[%c0_3, %c0_4] : memref<1x64xf32, #tpu.memory_space<vmem>>, vector<1x64xf32>
    %4 = vector.broadcast %3 : vector<1x64xf32> to vector<16x64xf32>
    %5 = arith.addf %2, %4 : vector<16x64xf32>
    %c0_5 = arith.constant 0 : index
    %c0_6 = arith.constant 0 : index
    %6 = vector.load %arg4[%c0_5, %c0_6] : memref<16x64xf32, #tpu.memory_space<vmem>>, vector<16x64xf32>
    tpu.vector_store %arg4[%c0_5, %c0_6], %5 {strides = array<i32>} : memref<16x64xf32, #tpu.memory_space<vmem>>, vector<16x64xf32>,
    return
  }
  func.func @transform_0(%arg0: i32) -> (i32, i32) {
    %c0_i32 = arith.constant 0 : i32
    %c0_i32_0 = arith.constant 0 : i32
    return %arg0, %c0_i32 : i32, i32
  }
  func.func @transform_1(%arg0: i32) -> (i32, i32) {
    %c0_i32 = arith.constant 0 : i32
    %c0_i32_0 = arith.constant 0 : i32
    %c0_i32_1 = arith.constant 0 : i32
    return %c0_i32, %c0_i32_0 : i32, i32
  }
  func.func @transform_2(%arg0: i32) -> (i32, i32) {
    %c0_i32 = arith.constant 0 : i32
    %c0_i32_0 = arith.constant 0 : i32
    %c0_i32_1 = arith.constant 0 : i32
    return %c0_i32, %c0_i32_0 : i32, i32
  }
  func.func @transform_3(%arg0: i32) -> (i32, i32) {
    %c0_i32 = arith.constant 0 : i32
    %c0_i32_0 = arith.constant 0 : i32
    return %arg0, %c0_i32 : i32, i32
  }
}

</mosaic_0001>

<bundles_post_ra>
// kernel: adapter_forward.1
= control target key start
LH: loop header
LB: loop body
LE: loop exit
PB: predicated region body
PF: predicated region fallthrough
CT: control target
= control target key end

     0   :  { %8 = vsyncpa [#allocation3], 0  ;;  %s246_s0 = inlined_call_operand.hbm [shape: f32[16,32], index: 0, kind: input, shape index: {}]   ;;  %s247_s1 = inlined_call_operand.hbm [shape: f32[32,64], index: 1, kind: input, shape index: {}]   ;;  %s248_s2 = inlined_call_operand.vmem [shape: f32[1,64], index: 2, kind: input, shape index: {}]   ;;  %s249_s3 = inlined_call_operand.hbm [shape: f32[16,64], index: 3, kind: output, shape index: {}]  }
   0x1   :  { %9 = vsyncpa [#allocation6], 0 }
   0x2   :  { %10 = vsyncpa [#allocation4], 0  ;;  %s15_s14 = sshll.u32 %s246_s0, 4  ;;  %s200_s15 = smov [#allocation2]   ;;  %s16_s14 = int_to_ptr.hbm [resolvable:$true] %s15_s14 }
   0x3   :  { %s17_s16 = sshll.u32 %s200_s15, 4  ;;  %s28_s19 = sshll.u32 %s247_s1, 4  ;;  %s18_s16 = int_to_ptr.vmem [resolvable:$true] %s17_s16  ;;  %s29_s19 = int_to_ptr.hbm [resolvable:$true] %s28_s19 }
   0x4   :  { %s201_s20 = smov 128   ;;  %s202_s21 = smov 8  }
   0x5   :  { %23 = dma.hbm_to_vmem [thread:$0]  %s16_s14, 256, %s18_s16, [#allocation3], %s201_s20, %s201_s20, %s202_s21  }
   0x6   :  { %s203_s22 = smov [#allocation5]  }
   0x7   :  { %s30_s23 = sshll.u32 %s203_s22, 4  ;;  %s31_s23 = int_to_ptr.vmem [resolvable:$true] %s30_s23 }
   0x8   :  { %36 = dma.hbm_to_vmem [thread:$0]  %s29_s19, 512, %s31_s23, [#allocation6], %s201_s20, %s201_s20, %s202_s21  }
   0x9   :  { %194 = dma.done.wait [#allocation3], 256  }
   0xa   :  { %195 = vsyncadd [#allocation3], 4294967040 }
   0xb   :  { %196 = dma.done.wait [#allocation6], 512  }
   0xc   :  { %197 = vsyncadd [#allocation6], 4294966784  ;;  %v52_v0 = vld [vmem:[#allocation5 + $0x18] sm:$0xff]  ;;  %v51_v1 = vld [vmem:[#allocation5 + $0x10] sm:$0xff]  ;;  %vm57_vm0 = vcmask 261120   ;;  %s204_s24 = smov [#allocation7]  }
   0xd   :  { %76 = vmatpush.msra.mxu0 %v52_v0  ;;  %112 = vmatpush.msra.mxu1 %v52_v0  ;;  %v50_v2 = vld [vmem:[#allocation5 + $0x8] sm:$0xff]  ;;  %v49_v3 = vld [vmem:[#allocation5] sm:$0xff]  ;;  %v47_v4 = vld [vmem:[#allocation2] sm:$0xff]  ;;  %s94_s25 = sshll.u32 %s204_s24, 4  ;;  %s96_s28 = sshll.u32 %s249_s3, 4  ;;  %vm87_vm1 = vcmask 523264   ;;  %s95_s25 = int_to_ptr.vmem [resolvable:$true] %s94_s25  ;;  %s97_s28 = int_to_ptr.hbm [resolvable:$true] %s96_s28 }
   0xe   :  { %v48_v5 = vld [vmem:[#allocation2 + $0x8] sm:$0xff]  ;;  %v121_v6 = vld [vmem:[%s248_s2] ss:$0 sm:$0xff] }
   0xf   :  { %77 = vmatpush.msra.mxu0 %v51_v1  ;;  %113 = vmatpush.msra.mxu1 %v51_v1 }
  0x11   :  { %78 = vmatpush.msra.mxu0 %v50_v2  ;;  %114 = vmatpush.msra.mxu1 %v50_v2 }
  0x13   :  { %79 = vmatpush.msra.mxu0 %v49_v3  ;;  %115 = vmatpush.msra.mxu1 %v49_v3 }
  0x14   :  { %110 = vmatmul.msk.f32.vlgmr.msra.gmra.mxu0 %vm57_vm0, %v47_v4  ;;  %111 = vmatmul.msk.f32.vlgmr.msra.gmra.mxu1 %vm57_vm0, %v48_v5 }
  0x91   :  { %v81_v7 = vpop.f32.mrf.mxu0  ;;  %v84_v8 = vpop.f32.mrf.mxu1 }
  0x92   :  { %v82_v9 = vadd.f32 %v121_v6, %v81_v7  ;;  %v85_v10 = vadd.f32 %v121_v6, %v84_v8 }
  0x94   :  { %88 = vst.msk [vmem:[#allocation7] sm:$0xff] %vm87_vm1, %v82_v9 }
  0x95   :  { %89 = vst.msk [vmem:[#allocation7 + $0x8] sm:$0xff] %vm87_vm1, %v85_v10 }
  0x96   :  { %102 = dma.vmem_to_hbm [thread:$0]  %s95_s25, 256, %s97_s28, [#allocation4], %s201_s20, %s201_s20, %s202_s21  }
  0x97   :  { %198 = dma.done.wait [#allocation4], 256  }
  0x98   :  { %199 = vsyncadd [#allocation4], 4294967040 }
  0x99   :  { %107 = vsyncpa [#allocation3], 1 }
  0x9a   :  { %108 = vsyncpa [#allocation6], 1 }
  0x9b   :  { %109 = vsyncpa [#allocation4], 1 }

</bundles_post_ra>
